<compile_context>
chip_gen: v6e
topology: v6e:2x2x1
jax: 0.10.0
libtpu: 0.0.40
codegen_flags: <defaults>
</compile_context>

<pallas_src>
import jax
import jax.numpy as jnp
from jax import lax
from jax.experimental import pallas as pl
from jax.experimental.pallas import tpu as pltpu


def linear_kernel(x_ref, w_ref, b_ref, o_ref):
    # x_ref: (N, in_f) f32 in VMEM
    # w_ref: (in_f,)   f32 in SMEM   (nn.Linear weight for out_features == 1, flattened)
    # b_ref: (1,)      f32 in SMEM
    # o_ref: (N, 1)    f32 in VMEM   (lane-sparse masked store is accepted at this size)
    x = x_ref[...]
    n, in_f = x.shape

    # Build the (1, in_f) weight row once from the SMEM scalars
    # (one broadcast + in_f-1 lane-selects); avoids per-feature lane slices and the MXU.
    lane = lax.broadcasted_iota(jnp.int32, (1, in_f), 1)
    w_row = jnp.full((1, in_f), w_ref[0], dtype=jnp.float32)
    for k in range(1, in_f):
        w_row = jnp.where(lane == k, w_ref[k], w_row)

    # One whole-tile VPU multiply + a single lane reduce; bias folded directly in.
    p = x * w_row
    o_ref[...] = jnp.sum(p, axis=-1, keepdims=True) + b_ref[0]


def model_forward(x, weight, bias):
    """x: (N, in_f); weight: (out_f, in_f) with out_f == 1; bias: (out_f,)."""
    n, in_f = x.shape
    out_f = weight.shape[0]
    assert out_f == 1, "Model spec is nn.Linear(2, 1)"
    w_flat = weight.reshape(-1)  # (in_f,) — trace-time reshape, nothing in-kernel

    out = pl.pallas_call(
        linear_kernel,
        out_shape=jax.ShapeDtypeStruct((n, out_f), jnp.float32),
        in_specs=[
            pl.BlockSpec(memory_space=pltpu.MemorySpace.VMEM),   # x: whole array in VMEM
            pl.BlockSpec(memory_space=pltpu.MemorySpace.SMEM),   # weight scalars
            pl.BlockSpec(memory_space=pltpu.MemorySpace.SMEM),   # bias scalar
        ],
        out_specs=pl.BlockSpec(memory_space=pltpu.MemorySpace.VMEM),
        cost_estimate=pl.CostEstimate(
            flops=2 * n * in_f,
            transcendentals=0,
            bytes_accessed=4 * (n * in_f + in_f + 1 + n),
        ),
    )(x, w_flat, bias)

    # unsqueeze(1) + the two identity torch.stack calls net out to (N, 1, out_f);
    # this reshape is metadata-only and kept outside the kernel.
    return out.reshape(n, 1, out_f)


if __name__ == "__main__":
    key = jax.random.PRNGKey(0)
    kx, kw, kb = jax.random.split(key, 3)

    # Input consistent with the module's test tensor: torch.randn(4, 2)
    x = jax.random.normal(kx, (4, 2), dtype=jnp.float32)

    # Deterministic parameters for nn.Linear(2, 1): weight (1, 2), bias (1,)
    weight = jax.random.normal(kw, (1, 2), dtype=jnp.float32) * 0.5
    bias = jax.random.normal(kb, (1,), dtype=jnp.float32) * 0.1

    fwd = jax.jit(model_forward)
    y = jax.block_until_ready(fwd(x, weight, bias))

    # Sanity check against plain-JAX reference.
    ref = (x @ weight.T + bias).reshape(4, 1, 1)
    assert y.shape == (4, 1, 1)
    assert jnp.allclose(y, ref, atol=1e-5, rtol=1e-5)

    print("KERNEL_OK")
</pallas_src>

<mosaic_0001>
module attributes {stable_mosaic.version = 11 : i64} {
  func.func @linear_kernel(%arg0: memref<4x2xf32, #tpu.memory_space<vmem>>, %arg1: memref<2xf32, #tpu.memory_space<smem>>, %arg2: memref<1xf32, #tpu.memory_space<smem>>, %arg3: memref<4x1xf32, #tpu.memory_space<vmem>>) attributes {dimension_semantics = [], scalar_prefetch = 0 : i64, scratch_operands = 0 : i64, tpu.core_type = #tpu.core_type<tc>} {
    %c0 = arith.constant 0 : index
    %c0_0 = arith.constant 0 : index
    %0 = vector.load %arg0[%c0, %c0_0] : memref<4x2xf32, #tpu.memory_space<vmem>>, vector<4x2xf32>
    %1 = tpu.iota {dimensions = array<i32: 1>} : vector<1x2xi32>
    %c0_1 = arith.constant 0 : index
    %2 = memref.load %arg1[%c0_1] : memref<2xf32, #tpu.memory_space<smem>>
    %3 = vector.broadcast %2 : f32 to vector<1x2xf32>
    %c1_i32 = arith.constant 1 : i32
    %4 = vector.broadcast %c1_i32 : i32 to vector<1x2xi32>
    %5 = arith.cmpi eq, %1, %4 : vector<1x2xi32>
    %c1 = arith.constant 1 : index
    %6 = memref.load %arg1[%c1] : memref<2xf32, #tpu.memory_space<smem>>
    %7 = vector.broadcast %6 : f32 to vector<1x2xf32>
    %8 = arith.select %5, %7, %3 : vector<1x2xi1>, vector<1x2xf32>
    %9 = vector.broadcast %8 : vector<1x2xf32> to vector<4x2xf32>
    %10 = arith.mulf %0, %9 : vector<4x2xf32>
    %cst = arith.constant dense<0.000000e+00> : vector<4xf32>
    %11 = vector.multi_reduction <add>, %10, %cst [1] : vector<4x2xf32> to vector<4xf32>
    %12 = vector.shape_cast %11 : vector<4xf32> to vector<4x1xf32>
    %c0_2 = arith.constant 0 : index
    %13 = memref.load %arg2[%c0_2] : memref<1xf32, #tpu.memory_space<smem>>
    %14 = vector.broadcast %13 : f32 to vector<4x1xf32>
    %15 = arith.addf %12, %14 : vector<4x1xf32>
    %c0_3 = arith.constant 0 : index
    %c0_4 = arith.constant 0 : index
    %16 = vector.load %arg3[%c0_3, %c0_4] : memref<4x1xf32, #tpu.memory_space<vmem>>, vector<4x1xf32>
    tpu.vector_store %arg3[%c0_3, %c0_4], %15 {strides = array<i32>} : memref<4x1xf32, #tpu.memory_space<vmem>>, vector<4x1xf32>,
    return
  }
}

</mosaic_0001>

<bundles_post_ra>
// kernel: model_forward.1
= control target key start
LH: loop header
LB: loop body
LE: loop exit
PB: predicated region body
PF: predicated region fallthrough
CT: control target
= control target key end

     0   :  { %9 = vsyncpa [#allocation4], 0  ;;  %s101_s0 = inlined_call_operand.vmem [shape: f32[4,2], index: 0, kind: input, shape index: {}]   ;;  %s102_s1 = inlined_call_operand.vmem [shape: f32[2], index: 1, kind: input, shape index: {}]   ;;  %s103_s2 = inlined_call_operand.<no memory space> [shape: f32[1], index: 2, kind: input, shape index: {}]   ;;  %s104_s3 = inlined_call_operand.vmem [shape: f32[4,1], index: 3, kind: output, shape index: {}]  }
   0x1   :  { %s18_s14 = sshll.u32 %s102_s1, 4  ;;  %s19_s14 = int_to_ptr.vmem [resolvable:$true] %s18_s14 }
   0x2   :  { %s54_s15 = scalar_lea.vmem %s19_s14, 16  ;;  %p59_p1 = scmp.lt.s32.totalorder %s19_s14, %s19_s14 }
   0x3   :  { %p55_p0 = scmp.ne.s32.totalorder %s19_s14, %s54_s15  ;;  %p60_p2 = scmp.lt.s32.totalorder %s54_s15, %s54_s15 }
   0x5   :  { %p61_p3 = por %p60_p2, %p59_p1 }
   0x7   :  { %p62_p4 = pnand %p61_p3, %p55_p0 }
   0x9   :  { %65 = shalt.err (!%p62_p4)
}
   0xa   :  { %s68_s16 = smov [#allocation3]  }
   0xb   :  { %21 = dma.vmem_to_smem %s19_s14, 16, %s68_s16, [#allocation4]  }
   0xc   :  { %66 = dma.done.wait [#allocation4], 16  }
   0xd   :  { %67 = vsyncadd [#allocation4], 4294967280 }
   0xe   :  { %27 = sfence }
   0xf   :  { %v29_v0 = vlaneseq  ;;  %s31_s17 = sld [smem:[#allocation3]]  ;;  %v28_v2 = vld [vmem:[%s101_s0] sm:$0xf]  ;;  %vm38_vm1 = vcmask 11264   ;;  %v43_v8 = vstv %s103_s2  ;;  %vm45_vm2 = vcmask 3072  }
  0x10   :  { %s52_s18 = sld [smem:[#allocation3 + $0x1]] }
  0x11   :  { %v30_v1 = vand.u32 127, %v29_v0 }
  0x13   :  { %vm33_vm0 = vcmp.eq.s32.totalorder %v30_v1, 1 }
  0x15   :  { %v32_v3 = vstv %s31_s17 }
  0x16   :  { %v35_v4 = vstv %s52_s18 }
  0x17   :  { %v36_v5 = vsel %vm33_vm0, %v35_v4, %v32_v3 }
  0x18   :  { %v37_v6 = vmul.f32 %v36_v5, %v28_v2 }
  0x1a   :  { %v39_v7 = vsel %vm38_vm1, %v37_v6, 0.0 }
  0x1b   :  { %40 = vadd.xlane.f32.xlu0 %v39_v7 }
  0xa4   :  { %v41_v9 = vpop.xlane.xlu0 %40 }
  0xa5   :  { %v44_v10 = vadd.f32 %v43_v8, %v41_v9 }
  0xa7   :  { %46 = vst.msk [vmem:[%s104_s3] sm:$0xf] %vm45_vm2, %v44_v10 }
  0xa8   :  { %51 = vsyncpa [#allocation4], 1 }

</bundles_post_ra>
